<compile_context>
chip_gen: v5e
topology: v5e:2x2
jax: 0.10.0
libtpu: 0.0.40
codegen_flags: <defaults>
</compile_context>

<pallas_src>
import math

import jax
import jax.numpy as jnp
from jax.experimental import pallas as pl
from jax.experimental.pallas import tpu as pltpu


def _round_up(x, m):
    return ((x + m - 1) // m) * m


def _cdiv(a, b):
    return (a + b - 1) // b


def _vmem_physical_bytes():
    """Physical VMEM per core (v5e/v6e: 128 MiB, v7x: 64 MiB); safe fallback."""
    try:
        info = pltpu.get_tpu_info()
        return int(getattr(info, "vmem_capacity_bytes", 64 << 20))
    except Exception:
        return 64 << 20  # conservative (v7x)


def _market_state_kernel(feat_ref, seq_ref,
                         w1f_ref, w1s_ref, b1_ref,
                         wo_ref, bo_ref,
                         out_ref,
                         seq_acc):
    """Grid = (batch tiles [parallel], seq-column tiles [arbitrary, innermost]).

    NOTE: correctness of the resident accumulator depends on the sequence
    (column) axis staying the LAST grid dimension and being "arbitrary";
    do not reorder the grid or split it across cores.
    """
    s = pl.program_id(1)

    @pl.when(s == 0)
    def _init():
        seq_acc[...] = jnp.zeros_like(seq_acc)

    # Lane-dense streamed reduction over the flattened [B, S*F] sequence.
    # The [TB, TW] tile holds TW // W_ACC lane groups; each group covers a
    # whole number of time steps (W_ACC = lcm(F, 128) lanes), so folding the
    # groups into the resident [TB, W_ACC] accumulator is a pure full-lane
    # VPU add.  The static 128-aligned lane slices are free views.
    w_acc = seq_acc.shape[1]
    n_groups = seq_ref.shape[1] // w_acc
    acc = seq_acc[...]
    for g in range(n_groups):
        acc = acc + seq_ref[:, g * w_acc:(g + 1) * w_acc]
    seq_acc[...] = acc

    @pl.when(s == pl.num_programs(1) - 1)
    def _finalize():
        # Hidden layer: block-structured weights give a lane-dense [TB, HP]
        # activation (feature branch in lanes 0:H, sequence branch in H:2H,
        # zeros elsewhere -> tanh(0) = 0, killed by zero rows of Wo).  The
        # per-time-step un-fold of the accumulator and the 1/S mean scale are
        # absorbed into w1s (rows replicated W_ACC // F times).
        h = jnp.tanh(
            jnp.dot(feat_ref[...], w1f_ref[...],
                    preferred_element_type=jnp.float32)
            + jnp.dot(seq_acc[...], w1s_ref[...],
                      preferred_element_type=jnp.float32)
            + b1_ref[...])
        # Fused output head: single [HP, DP] matmul, lane-dense store.
        out = jnp.dot(h, wo_ref[...], preferred_element_type=jnp.float32) \
            + bo_ref[...]
        out_ref[...] = out.astype(out_ref.dtype)


def model_wrapper_forward(features, sequence, params):
    """Pallas-backed forward pass. Returns market_state [B, D] (float32)."""
    B, F = features.shape
    Bs, S, F2 = sequence.shape
    assert B == Bs and F == F2
    H = params["w_feat"].shape[1]
    D = params["w_out_feat"].shape[1]
    f32 = jnp.float32

    # Lane-pad the hidden (2H) and output (D) widths to multiples of 128.
    HP = _round_up(max(2 * H, 128), 128)
    DP = _round_up(max(D, 128), 128)
    # Accumulator lane width: smallest multiple of 128 holding whole time steps.
    W_ACC = (F * 128) // math.gcd(F, 128)  # lcm(F, 128)

    # --- weight packing (once per call; tiny) ------------------------------
    w1f = jnp.zeros((F, HP), f32).at[:, :H].set(params["w_feat"].astype(f32))
    w1s_base = jnp.zeros((F, HP), f32).at[:, H:2 * H].set(
        params["w_seq"].astype(f32) * (1.0 / S))       # fold 1/S (mean) in
    # Replicate rows W_ACC // F times: the accumulator holds the time-sum
    # split across 128-lane groups; replicated rows fold it back in the matmul.
    w1s = jnp.tile(w1s_base, (W_ACC // F, 1))
    b1 = jnp.zeros((1, HP), f32)
    b1 = b1.at[:, :H].set(params["b_feat"].astype(f32).reshape(1, H))
    b1 = b1.at[:, H:2 * H].set(params["b_seq"].astype(f32).reshape(1, H))
    wo = jnp.zeros((HP, DP), f32)
    wo = wo.at[:H, :D].set(params["w_out_feat"].astype(f32))
    wo = wo.at[H:2 * H, :D].set(params["w_out_seq"].astype(f32))
    bo = jnp.zeros((1, DP), f32).at[:, :D].set(
        params["b_out"].astype(f32).reshape(1, D))

    # --- batch tiling -------------------------------------------------------
    if B <= 8:
        TB, B_pad = B, B                      # full-dim block, no pad needed
    else:
        B_pad = _round_up(B, 8)               # f32 sublane alignment
        # At least two batch tiles so both TensorCores get work (v7x megacore).
        TB = min(128, _round_up(_cdiv(B_pad, 2), 8))
        B_pad = _round_up(B_pad, TB)

    # --- sequence: flatten to [B, S*F] (contiguous -> free) and stream
    #     lane-dense column tiles.  Zero column-padding only if S*F is not a
    #     multiple of W_ACC (safe: the true 1/S is already folded into w1s).
    #     NOTE: streaming bf16 (accumulate f32) would halve HBM bytes if
    #     numerically acceptable; kept f32 here to match the f32 reference.
    seq2d = sequence.astype(f32).reshape(B, S * F)
    X = S * F
    X_pad = _round_up(X, W_ACC)

    feats = features.astype(f32)
    if B_pad != B:                             # at most 7 extra rows
        feats = jnp.pad(feats, ((0, B_pad - B), (0, 0)))
        seq2d = jnp.pad(seq2d, ((0, B_pad - B), (0, 0)))
    if X_pad != X:
        seq2d = jnp.pad(seq2d, ((0, 0), (0, X_pad - X)))

    # --- per-generation VMEM sizing ----------------------------------------
    phys = _vmem_physical_bytes()              # 128 MiB (v5e/v6e) / 64 MiB (v7x)
    vmem_limit = int(min(phys // 2, 64 << 20))
    seq_budget = vmem_limit // 3               # double-buffered sequence stream
    n_total = X_pad // W_ACC
    k = 1
    for cand in range(1, n_total + 1):
        if cand > 64:                          # keep the unrolled fold loop small
            break
        if n_total % cand:
            continue
        if 2 * TB * cand * W_ACC * 4 <= seq_budget:
            k = cand
    TW = k * W_ACC                             # streamed tile width (lanes)

    grid = (B_pad // TB, X_pad // TW)

    def _const(b, s):
        return (0, 0)

    # Weights/biases never change block index; single-buffer them so each uses
    # one VMEM copy for the whole kernel (matters at real HP/DP under v7x's
    # 64 MiB VMEM).
    def wspec(shape):
        return pl.BlockSpec(shape, _const, pipeline_mode=pl.Buffered(1))

    out_padded = pl.pallas_call(
        _market_state_kernel,
        out_shape=jax.ShapeDtypeStruct((B_pad, DP), jnp.float32),
        grid_spec=pltpu.PrefetchScalarGridSpec(
            num_scalar_prefetch=0,
            grid=grid,
            in_specs=[
                # batch-tiled activations (feat block index constant over s ->
                # stays VMEM-resident for the whole inner reduction)
                pl.BlockSpec((TB, F), lambda b, s: (b, 0)),
                # lane-dense streamed sequence slab
                pl.BlockSpec((TB, TW), lambda b, s: (b, s)),
                # resident, single-buffered weights/biases
                wspec((F, HP)),
                wspec((W_ACC, HP)),
                wspec((1, HP)),
                wspec((HP, DP)),
                wspec((1, DP)),
            ],
            out_specs=pl.BlockSpec((TB, DP), lambda b, s: (b, 0)),
            scratch_shapes=[pltpu.VMEM((TB, W_ACC), jnp.float32)],
        ),
        compiler_params=pltpu.CompilerParams(
            # batch tiles split across TensorCores; the sequence-column axis is
            # the resident-accumulator reduction and MUST stay innermost and
            # "arbitrary".
            dimension_semantics=("parallel", "arbitrary"),
            vmem_limit_bytes=vmem_limit),
    )(feats, seq2d, w1f, w1s, b1, wo, bo)

    return out_padded[:B, :D]


def init_params(key, feat_dim, hidden_dim, state_dim):
    """Deterministic synthetic parameter init (biases kept 2-D: [1, N])."""
    k = jax.random.split(key, 5)
    scale = 0.1
    return {
        "w_feat":     scale * jax.random.normal(k[0], (feat_dim, hidden_dim), jnp.float32),
        "b_feat":     jnp.zeros((1, hidden_dim), jnp.float32),
        "w_seq":      scale * jax.random.normal(k[1], (feat_dim, hidden_dim), jnp.float32),
        "b_seq":      jnp.zeros((1, hidden_dim), jnp.float32),
        "w_out_feat": scale * jax.random.normal(k[2], (hidden_dim, state_dim), jnp.float32),
        "w_out_seq":  scale * jax.random.normal(k[3], (hidden_dim, state_dim), jnp.float32),
        "b_out":      scale * jax.random.normal(k[4], (1, state_dim), jnp.float32),
    }


def _reference_forward(features, sequence, params):
    """Pure-JAX reference (full-precision matmuls) for correctness checking."""
    hp = jax.lax.Precision.HIGHEST
    seq_mean = jnp.mean(sequence, axis=1)
    h_feat = jnp.tanh(jnp.dot(features, params["w_feat"], precision=hp)
                      + params["b_feat"])
    h_seq = jnp.tanh(jnp.dot(seq_mean, params["w_seq"], precision=hp)
                     + params["b_seq"])
    return (jnp.dot(h_feat, params["w_out_feat"], precision=hp)
            + jnp.dot(h_seq, params["w_out_seq"], precision=hp)
            + params["b_out"])


if __name__ == "__main__":
    B, S, F, H, D = 2, 8, 16, 32, 8

    key = jax.random.PRNGKey(0)
    k_feat, k_seq, k_params = jax.random.split(key, 3)

    features = jax.random.normal(k_feat, (B, F), jnp.float32)    # [B, F]
    sequence = jax.random.normal(k_seq, (B, S, F), jnp.float32)  # [B, S, F]
    params = init_params(k_params, F, H, D)

    fwd = jax.jit(model_wrapper_forward)
    market_state = jax.block_until_ready(fwd(features, sequence, params))

    ref = _reference_forward(features, sequence, params)
    assert market_state.shape == (B, D)
    err = float(jnp.max(jnp.abs(market_state - ref)))
    assert err < 2e-3, err

    print("KERNEL_OK")
</pallas_src>

<mosaic_0001>
module attributes {stable_mosaic.version = 11 : i64} {
  func.func @_market_state_kernel(%arg0: i32, %arg1: i32, %arg2: memref<2x16xf32, #tpu.memory_space<vmem>>, %arg3: memref<2x128xf32, #tpu.memory_space<vmem>>, %arg4: memref<16x128xf32, #tpu.memory_space<vmem>>, %arg5: memref<128x128xf32, #tpu.memory_space<vmem>>, %arg6: memref<1x128xf32, #tpu.memory_space<vmem>>, %arg7: memref<128x128xf32, #tpu.memory_space<vmem>>, %arg8: memref<1x128xf32, #tpu.memory_space<vmem>>, %arg9: memref<2x128xf32, #tpu.memory_space<vmem>>, %arg10: memref<2x128xf32, #tpu.memory_space<vmem>>) attributes {dimension_semantics = [#tpu.dimension_semantics<parallel>, #tpu.dimension_semantics<arbitrary>], iteration_bounds = array<i64: 1, 1>, scalar_prefetch = 0 : i64, scratch_operands = 1 : i64, tpu.core_type = #tpu.core_type<tc>, window_params = [{transform_indices = @transform_0, window_bounds = array<i64: 2, 16>}, {transform_indices = @transform_1, window_bounds = array<i64: 2, 128>}, {pipeline_mode = #tpu.pipeline_mode<synchronous>, transform_indices = @transform_2, window_bounds = array<i64: 16, 128>}, {pipeline_mode = #tpu.pipeline_mode<synchronous>, transform_indices = @transform_3, window_bounds = array<i64: 128, 128>}, {pipeline_mode = #tpu.pipeline_mode<synchronous>, transform_indices = @transform_4, window_bounds = array<i64: 1, 128>}, {pipeline_mode = #tpu.pipeline_mode<synchronous>, transform_indices = @transform_5, window_bounds = array<i64: 128, 128>}, {pipeline_mode = #tpu.pipeline_mode<synchronous>, transform_indices = @transform_6, window_bounds = array<i64: 1, 128>}, {transform_indices = @transform_7, window_bounds = array<i64: 2, 128>}]} {
    %c0_i32 = arith.constant 0 : i32
    %0 = arith.cmpi eq, %arg1, %c0_i32 : i32
    %1 = arith.extui %0 : i1 to i32
    %c0_i32_0 = arith.constant 0 : i32
    %2 = arith.cmpi ne, %1, %c0_i32_0 : i32
    scf.if %2 {
      %cst = arith.constant 0.000000e+00 : f32
      %10 = vector.broadcast %cst : f32 to vector<2x128xf32>
      %c0_8 = arith.constant 0 : index
      %c0_9 = arith.constant 0 : index
      %11 = vector.load %arg10[%c0_8, %c0_9] : memref<2x128xf32, #tpu.memory_space<vmem>>, vector<2x128xf32>
      tpu.vector_store %arg10[%c0_8, %c0_9], %10 {strides = array<i32>} : memref<2x128xf32, #tpu.memory_space<vmem>>, vector<2x128xf32>,
    } else {
    }
    %c0 = arith.constant 0 : index
    %c0_1 = arith.constant 0 : index
    %3 = vector.load %arg10[%c0, %c0_1] : memref<2x128xf32, #tpu.memory_space<vmem>>, vector<2x128xf32>
    %c0_2 = arith.constant 0 : index
    %c0_3 = arith.constant 0 : index
    %4 = vector.load %arg3[%c0_2, %c0_3] : memref<2x128xf32, #tpu.memory_space<vmem>>, vector<2x128xf32>
    %5 = arith.addf %3, %4 : vector<2x128xf32>
    %c0_4 = arith.constant 0 : index
    %c0_5 = arith.constant 0 : index
    %6 = vector.load %arg10[%c0_4, %c0_5] : memref<2x128xf32, #tpu.memory_space<vmem>>, vector<2x128xf32>
    tpu.vector_store %arg10[%c0_4, %c0_5], %5 {strides = array<i32>} : memref<2x128xf32, #tpu.memory_space<vmem>>, vector<2x128xf32>,
    %c0_i32_6 = arith.constant 0 : i32
    %7 = arith.cmpi eq, %arg1, %c0_i32_6 : i32
    %8 = arith.extui %7 : i1 to i32
    %c0_i32_7 = arith.constant 0 : i32
    %9 = arith.cmpi ne, %8, %c0_i32_7 : i32
    scf.if %9 {
      %c0_8 = arith.constant 0 : index
      %c0_9 = arith.constant 0 : index
      %10 = vector.load %arg2[%c0_8, %c0_9] : memref<2x16xf32, #tpu.memory_space<vmem>>, vector<2x16xf32>
      %c0_10 = arith.constant 0 : index
      %c0_11 = arith.constant 0 : index
      %11 = vector.load %arg4[%c0_10, %c0_11] : memref<16x128xf32, #tpu.memory_space<vmem>>, vector<16x128xf32>
      %cst = arith.constant dense<0.000000e+00> : vector<2x128xf32>
      %12 = tpu.matmul %10, %11, %cst {dimension_numbers = #tpu.dot_dimension_numbers<[1], [0], [0], [1], [0, 0, 1, 1], [], []>} : vector<2x16xf32>, vector<16x128xf32>, vector<2x128xf32> -> vector<2x128xf32>
      %c0_12 = arith.constant 0 : index
      %c0_13 = arith.constant 0 : index
      %13 = vector.load %arg10[%c0_12, %c0_13] : memref<2x128xf32, #tpu.memory_space<vmem>>, vector<2x128xf32>
      %c0_14 = arith.constant 0 : index
      %c0_15 = arith.constant 0 : index
      %14 = vector.load %arg5[%c0_14, %c0_15] : memref<128x128xf32, #tpu.memory_space<vmem>>, vector<128x128xf32>
      %cst_16 = arith.constant dense<0.000000e+00> : vector<2x128xf32>
      %15 = tpu.matmul %13, %14, %cst_16 {dimension_numbers = #tpu.dot_dimension_numbers<[1], [0], [0], [1], [0, 0, 1, 1], [], []>} : vector<2x128xf32>, vector<128x128xf32>, vector<2x128xf32> -> vector<2x128xf32>
      %16 = arith.addf %12, %15 : vector<2x128xf32>
      %c0_17 = arith.constant 0 : index
      %c0_18 = arith.constant 0 : index
      %17 = vector.load %arg6[%c0_17, %c0_18] : memref<1x128xf32, #tpu.memory_space<vmem>>, vector<1x128xf32>
      %18 = vector.broadcast %17 : vector<1x128xf32> to vector<2x128xf32>
      %19 = arith.addf %16, %18 : vector<2x128xf32>
      %20 = math.tanh %19 : vector<2x128xf32>
      %c0_19 = arith.constant 0 : index
      %c0_20 = arith.constant 0 : index
      %21 = vector.load %arg7[%c0_19, %c0_20] : memref<128x128xf32, #tpu.memory_space<vmem>>, vector<128x128xf32>
      %cst_21 = arith.constant dense<0.000000e+00> : vector<2x128xf32>
      %22 = tpu.matmul %20, %21, %cst_21 {dimension_numbers = #tpu.dot_dimension_numbers<[1], [0], [0], [1], [0, 0, 1, 1], [], []>} : vector<2x128xf32>, vector<128x128xf32>, vector<2x128xf32> -> vector<2x128xf32>
      %c0_22 = arith.constant 0 : index
      %c0_23 = arith.constant 0 : index
      %23 = vector.load %arg8[%c0_22, %c0_23] : memref<1x128xf32, #tpu.memory_space<vmem>>, vector<1x128xf32>
      %24 = vector.broadcast %23 : vector<1x128xf32> to vector<2x128xf32>
      %25 = arith.addf %22, %24 : vector<2x128xf32>
      %c0_24 = arith.constant 0 : index
      %c0_25 = arith.constant 0 : index
      %26 = vector.load %arg9[%c0_24, %c0_25] : memref<2x128xf32, #tpu.memory_space<vmem>>, vector<2x128xf32>
      tpu.vector_store %arg9[%c0_24, %c0_25], %25 {strides = array<i32>} : memref<2x128xf32, #tpu.memory_space<vmem>>, vector<2x128xf32>,
    } else {
    }
    return
  }
  func.func @transform_0(%arg0: i32, %arg1: i32) -> (i32, i32) {
    %c0_i32 = arith.constant 0 : i32
    %c0_i32_0 = arith.constant 0 : i32
    return %arg0, %c0_i32 : i32, i32
  }
  func.func @transform_1(%arg0: i32, %arg1: i32) -> (i32, i32) {
    %c0_i32 = arith.constant 0 : i32
    return %arg0, %arg1 : i32, i32
  }
  func.func @transform_2(%arg0: i32, %arg1: i32) -> (i32, i32) {
    %c0_i32 = arith.constant 0 : i32
    %c0_i32_0 = arith.constant 0 : i32
    %c0_i32_1 = arith.constant 0 : i32
    return %c0_i32, %c0_i32_0 : i32, i32
  }
  func.func @transform_3(%arg0: i32, %arg1: i32) -> (i32, i32) {
    %c0_i32 = arith.constant 0 : i32
    %c0_i32_0 = arith.constant 0 : i32
    %c0_i32_1 = arith.constant 0 : i32
    return %c0_i32, %c0_i32_0 : i32, i32
  }
  func.func @transform_4(%arg0: i32, %arg1: i32) -> (i32, i32) {
    %c0_i32 = arith.constant 0 : i32
    %c0_i32_0 = arith.constant 0 : i32
    %c0_i32_1 = arith.constant 0 : i32
    return %c0_i32, %c0_i32_0 : i32, i32
  }
  func.func @transform_5(%arg0: i32, %arg1: i32) -> (i32, i32) {
    %c0_i32 = arith.constant 0 : i32
    %c0_i32_0 = arith.constant 0 : i32
    %c0_i32_1 = arith.constant 0 : i32
    return %c0_i32, %c0_i32_0 : i32, i32
  }
  func.func @transform_6(%arg0: i32, %arg1: i32) -> (i32, i32) {
    %c0_i32 = arith.constant 0 : i32
    %c0_i32_0 = arith.constant 0 : i32
    %c0_i32_1 = arith.constant 0 : i32
    return %c0_i32, %c0_i32_0 : i32, i32
  }
  func.func @transform_7(%arg0: i32, %arg1: i32) -> (i32, i32) {
    %c0_i32 = arith.constant 0 : i32
    %c0_i32_0 = arith.constant 0 : i32
    return %arg0, %c0_i32 : i32, i32
  }
}

</mosaic_0001>

<bundles_post_ra>
// kernel: model_wrapper_forward.1
= control target key start
LH: loop header
LB: loop body
LE: loop exit
PB: predicated region body
PF: predicated region fallthrough
CT: control target
= control target key end

     0   :  { %v199_v2 = vmov 0.0   ;;  %vm79_vm0 = vcmask 130048   ;;  %s358_s0 = inlined_call_operand.vmem [shape: f32[2,16], index: 0, kind: input, shape index: {}]   ;;  %s359_s1 = inlined_call_operand.vmem [shape: f32[2,128], index: 1, kind: input, shape index: {}]   ;;  %s360_s2 = inlined_call_operand.vmem [shape: f32[16,128], index: 2, kind: input, shape index: {}]   ;;  %s361_s3 = inlined_call_operand.vmem [shape: f32[128,128], index: 3, kind: input, shape index: {}]   ;;  %s362_s4 = inlined_call_operand.vmem [shape: f32[1,128], index: 4, kind: input, shape index: {}]   ;;  %s363_s5 = inlined_call_operand.vmem [shape: f32[128,128], index: 5, kind: input, shape index: {}]   ;;  %s364_s6 = inlined_call_operand.vmem [shape: f32[1,128], index: 6, kind: input, shape index: {}]   ;;  %s365_s7 = inlined_call_operand.hbm [shape: f32[2,128], index: 7, kind: output, shape index: {}]  }
   0x1   :  { %v58_v0 = vld [vmem:[%s361_s3 + $0x78] sm:$0xff]  ;;  %v57_v1 = vld [vmem:[%s361_s3 + $0x70] sm:$0xff]  ;;  %31 = vst [vmem:[#allocation2] sm:$0x3] %v199_v2  ;;  %v56_v3 = vld [vmem:[%s361_s3 + $0x68] sm:$0xff] }
   0x2   :  { %59 = vmatpush.msra.mxu0 %v58_v0  ;;  %v55_v4 = vld [vmem:[%s361_s3 + $0x60] sm:$0xff]  ;;  %v54_v5 = vld [vmem:[%s361_s3 + $0x58] sm:$0xff]  ;;  %v41_v6 = vld [vmem:[%s360_s2 + $0x8] sm:$0xff] }
   0x3   :  { %v40_v7 = vld [vmem:[%s360_s2] sm:$0xff]  ;;  %97 = vmatpush.msra.mxu1 %v41_v6  ;;  %v124_v10 = vld [vmem:[%s363_s5 + $0x78] sm:$0xff]  ;;  %v123_v11 = vld [vmem:[%s363_s5 + $0x70] sm:$0xff] }
   0x4   :  { %60 = vmatpush.msra.mxu0 %v57_v1  ;;  %v33_v8 = vld [vmem:[%s359_s1] sm:$0x3]  ;;  %129 = vmatpush.msra.mxu2 %v124_v10  ;;  %v53_v12 = vld [vmem:[%s361_s3 + $0x50] sm:$0xff]  ;;  %v122_v15 = vld [vmem:[%s363_s5 + $0x68] sm:$0xff] }
   0x5   :  { %v39_v9 = vld [vmem:[%s358_s0] sm:$0x3]  ;;  %98 = vmatpush.msra.mxu1 %v40_v7  ;;  %v52_v16 = vld [vmem:[%s361_s3 + $0x48] sm:$0xff] }
   0x6   :  { %61 = vmatpush.msra.mxu0 %v56_v3  ;;  %166 = vmatmul.msk.f32.vlgmr.msra.gmra.mxu1 %vm79_vm0, %v39_v9  ;;  %v121_v17 = vld [vmem:[%s363_s5 + $0x60] sm:$0xff] }
   0x7   :  { %130 = vmatpush.msra.mxu2 %v123_v11 }
   0x8   :  { %62 = vmatpush.msra.mxu0 %v55_v4  ;;  %v32_v13 = vld [vmem:[#allocation2] sm:$0x3] }
   0x9   :  { %v34_v14 = vadd.f32 %v33_v8, %v32_v13 }
   0xa   :  { %63 = vmatpush.msra.mxu0 %v54_v5 }
   0xb   :  { %35 = vst [vmem:[#allocation2] sm:$0x3] %v34_v14 }
   0xc   :  { %64 = vmatpush.msra.mxu0 %v53_v12 }
   0xd   :  { %12 = vsyncpa [#allocation4], 0  ;;  %v51_v18 = vld [vmem:[%s361_s3 + $0x40] sm:$0xff]  ;;  %131 = vmatpush.msra.mxu2 %v122_v15  ;;  %v120_v19 = vld [vmem:[%s363_s5 + $0x58] sm:$0xff]  ;;  %s200_s23 = smov [#allocation3]   ;;  %s157_s24 = sshll.u32 %s365_s7, 4  ;;  %s158_s24 = int_to_ptr.hbm [resolvable:$true] %s157_s24 }
   0xe   :  { %65 = vmatpush.msra.mxu0 %v52_v16  ;;  %v50_v20 = vld [vmem:[%s361_s3 + $0x38] sm:$0xff]  ;;  %v119_v21 = vld [vmem:[%s363_s5 + $0x50] sm:$0xff]  ;;  %v118_v23 = vld [vmem:[%s363_s5 + $0x48] sm:$0xff]  ;;  %s155_s0 = sshll.u32 %s200_s23, 4  ;;  %s156_s0 = int_to_ptr.vmem [resolvable:$true] %s155_s0 }
   0xf   :  { %132 = vmatpush.msra.mxu2 %v121_v17  ;;  %v49_v22 = vld [vmem:[%s361_s3 + $0x30] sm:$0xff]  ;;  %v48_v24 = vld [vmem:[%s361_s3 + $0x28] sm:$0xff]  ;;  %v117_v25 = vld [vmem:[%s363_s5 + $0x40] sm:$0xff] }
  0x10   :  { %66 = vmatpush.msra.mxu0 %v51_v18  ;;  %v47_v26 = vld [vmem:[%s361_s3 + $0x20] sm:$0xff]  ;;  %v116_v27 = vld [vmem:[%s363_s5 + $0x38] sm:$0xff]  ;;  %v115_v29 = vld [vmem:[%s363_s5 + $0x30] sm:$0xff] }
  0x11   :  { %133 = vmatpush.msra.mxu2 %v120_v19  ;;  %v46_v28 = vld [vmem:[%s361_s3 + $0x18] sm:$0xff]  ;;  %v45_v30 = vld [vmem:[%s361_s3 + $0x10] sm:$0xff]  ;;  %v44_v31 = vld [vmem:[%s361_s3 + $0x8] sm:$0xff] }
  0x12   :  { %67 = vmatpush.msra.mxu0 %v50_v20  ;;  %v43_v32 = vld [vmem:[%s361_s3] sm:$0xff]  ;;  %v114_v34 = vld [vmem:[%s363_s5 + $0x28] sm:$0xff]  ;;  %v112_v36 = vld [vmem:[%s363_s5 + $0x18] sm:$0xff] }
  0x13   :  { %134 = vmatpush.msra.mxu2 %v119_v21  ;;  %v42_v33 = vld [vmem:[#allocation2] sm:$0x3]  ;;  %v111_v37 = vld [vmem:[%s363_s5 + $0x10] sm:$0xff]  ;;  %v110_v38 = vld [vmem:[%s363_s5 + $0x8] sm:$0xff] }
  0x14   :  { %68 = vmatpush.msra.mxu0 %v49_v22  ;;  %v113_v35 = vld [vmem:[%s363_s5 + $0x20] sm:$0xff] }
  0x15   :  { %135 = vmatpush.msra.mxu2 %v118_v23  ;;  %v109_v39 = vld [vmem:[%s363_s5] sm:$0xff] }
  0x16   :  { %69 = vmatpush.msra.mxu0 %v48_v24  ;;  %v169_v41 = vld [vmem:[%s362_s4] ss:$0 sm:$0xff] }
  0x17   :  { %136 = vmatpush.msra.mxu2 %v117_v25  ;;  %v170_v46 = vld [vmem:[%s364_s6] ss:$0 sm:$0xff] }
  0x18   :  { %70 = vmatpush.msra.mxu0 %v47_v26 }
  0x19   :  { %137 = vmatpush.msra.mxu2 %v116_v27 }
  0x1a   :  { %71 = vmatpush.msra.mxu0 %v46_v28 }
  0x1b   :  { %138 = vmatpush.msra.mxu2 %v115_v29 }
  0x1c   :  { %72 = vmatpush.msra.mxu0 %v45_v30 }
  0x1d   :  { %139 = vmatpush.msra.mxu2 %v114_v34 }
  0x1e   :  { %73 = vmatpush.msra.mxu0 %v44_v31 }
  0x1f   :  { %140 = vmatpush.msra.mxu2 %v113_v35 }
  0x20   :  { %74 = vmatpush.msra.mxu0 %v43_v32 }
  0x21   :  { %75 = vmatmul.f32.vlgmr.msra.gmra.mxu0 %v42_v33  ;;  %141 = vmatpush.msra.mxu2 %v112_v36 }
  0x23   :  { %142 = vmatpush.msra.mxu2 %v111_v37 }
  0x25   :  { %143 = vmatpush.msra.mxu2 %v110_v38 }
  0x27   :  { %144 = vmatpush.msra.mxu2 %v109_v39 }
  0x83   :  { %v100_v40 = vpop.f32.mrf.mxu1 }
  0x9e   :  { %v76_v42 = vpop.f32.mrf.mxu0 }
  0x9f   :  { %v101_v43 = vadd.f32 %v100_v40, %v76_v42 }
  0xa1   :  { %v107_v44 = vadd.f32 %v169_v41, %v101_v43 }
  0xa3   :  { %171 = vtanh.f32 %v107_v44 }
  0xa9   :  { %v172_v45 = vpop.eup %171 }
  0xaa   :  { %145 = vmatmul.f32.vlgmr.msra.gmra.mxu2 %v172_v45 }
 0x12d   :  { %v146_v47 = vpop.f32.mrf.mxu2 }
 0x12e   :  { %v147_v48 = vadd.f32 %v170_v46, %v146_v47 }
 0x130   :  { %149 = vst [vmem:[#allocation3] sm:$0x3] %v147_v48 }
 0x131   :  { %160 = dma.vmem_to_hbm [thread:$0]  %s156_s0, 32, %s158_s24, [#allocation4]  }
 0x132   :  { %197 = dma.done.wait [#allocation4], 32  }
 0x133   :  { %198 = vsyncadd [#allocation4], 4294967264 }
 0x134   :  { %165 = vsyncpa [#allocation4], 1 }

</bundles_post_ra>
